<compile_context>
chip_gen: v5e
topology: v5e:2x2
jax: 0.10.0
libtpu: 0.0.40
codegen_flags: <defaults>
</compile_context>

<pallas_src>
import functools

import jax
import jax.numpy as jnp
from jax.experimental import pallas as pl
from jax.experimental.pallas import tpu as pltpu

_LANES = 128


def _dice_bce_kernel(probs_ref, labels_ref, out_ref):
    """Accumulate lane-resident partial sums [p*t, p, t, bce] per (sample, class)."""

    @pl.when(pl.program_id(1) == 0)
    def _():
        out_ref[...] = jnp.zeros_like(out_ref)

    p = probs_ref[...].astype(jnp.float32)     # (N, C, s_tile, 128)
    lab = labels_ref[...]                      # (N, s_tile, 128) int32
    C = p.shape[1]

    # one-hot of the labels computed on the fly (no materialized one-hot tensor)
    cls = jax.lax.broadcasted_iota(jnp.int32, (1, C, 1, 1), 1)
    t_mask = lab[:, None, :, :] == cls         # (N, C, s_tile, 128) bool
    t = t_mask.astype(jnp.float32)

    # single log per element: t is one-hot, so
    #   t*log(p) + (1-t)*log(1-p) == log(where(t, p, 1-p)); clamp at -100 like PyTorch BCE.
    bce = -jnp.maximum(jnp.log(jnp.where(t_mask, p, 1.0 - p)), -100.0)
    pt = jnp.where(t_mask, p, 0.0)

    # Reduce only the sublane/chunk axis; keep the 128-lane axis resident.
    # out_ref is the (resident) output block itself -> no scratch, no final copy-out.
    out_ref[0] += pt.sum(axis=2)
    out_ref[1] += p.sum(axis=2)
    out_ref[2] += t.sum(axis=2)
    out_ref[3] += bce.sum(axis=2)


@functools.partial(jax.jit, static_argnames=("vmem_budget_bytes", "num_parallel_chunks"))
def multiclass_dice_loss(probs_ncdhw, target_ndhw, *, vmem_budget_bytes=8 << 20,
                         num_parallel_chunks=2):
    N, C, D, H, W = probs_ncdhw.shape
    M = D * H * W

    # ---- tile sizing (all static, shape-derived Python ints) ----------------
    S_raw = -(-M // _LANES)                           # spatial rows of 128 lanes
    row_bytes = N * (C + 1) * _LANES * 4              # probs(f32) + labels(i32) per row
    s_tile = vmem_budget_bytes // (2 * row_bytes)     # double-buffered input budget
    s_tile = max(8, min(128, (s_tile // 8) * 8))      # multiple of 8 sublanes
    s_tile = min(s_tile, ((S_raw + 7) // 8) * 8)      # don't over-tile tiny inputs
    P = num_parallel_chunks if S_raw >= num_parallel_chunks * s_tile else 1
    steps = -(-S_raw // (P * s_tile))
    S = P * steps * s_tile
    Mp = S * _LANES

    # ---- layout: NO transpose; zero-copy reshapes; pad the ragged tail ------
    if probs_ncdhw.dtype not in (jnp.float32, jnp.bfloat16):
        probs_ncdhw = probs_ncdhw.astype(jnp.float32)  # bf16 inputs DMA'd narrow, upcast in-kernel
    probs = probs_ncdhw.reshape(N, C, M)
    labels = target_ndhw.reshape(N, M).astype(jnp.int32)
    if Mp != M:
        probs = jnp.pad(probs, ((0, 0), (0, 0), (0, Mp - M)))                 # pad p = 0 -> no contribution
        labels = jnp.pad(labels, ((0, 0), (0, Mp - M)), constant_values=-1)   # matches no class
    probs = probs.reshape(N, C, S, _LANES)
    labels = labels.reshape(N, S, _LANES)

    sums = pl.pallas_call(
        _dice_bce_kernel,
        out_shape=jax.ShapeDtypeStruct((P, 4, N, C, _LANES), jnp.float32),
        grid_spec=pltpu.PrefetchScalarGridSpec(
            num_scalar_prefetch=0,
            grid=(P, steps),
            in_specs=[
                pl.BlockSpec((N, C, s_tile, _LANES),
                             lambda p, m: (0, 0, p * steps + m, 0)),
                pl.BlockSpec((N, s_tile, _LANES),
                             lambda p, m: (0, p * steps + m, 0)),
            ],
            out_specs=pl.BlockSpec((None, 4, N, C, _LANES),
                                   lambda p, m: (p, 0, 0, 0, 0)),
        ),
        compiler_params=pltpu.CompilerParams(
            dimension_semantics=("parallel", "arbitrary")),
    )(probs, labels)

    # ---- scalar glue ---------------------------------------------------------
    sums = sums.sum(axis=(0, 4))                       # collapse chunk + lane axes -> (4, N, C)
    sum_pt, sum_p, sum_t, sum_bce = sums[0], sums[1], sums[2], sums[3]

    smooth = 1.0
    dice_eff = (2.0 * sum_pt + smooth) / (sum_p + sum_t + smooth)   # (N, C)
    dice_loss = 1.0 - dice_eff.sum(axis=0) / N                      # (C,)
    bce_loss = sum_bce.sum(axis=0) / (N * M)                        # (C,)  BCE 'mean' over real elems
    return (dice_loss + bce_loss).sum() / C


def _reference(probs, target):
    """Pure-JAX transcription of the PyTorch forward (for verification)."""
    N, C = probs.shape[0], probs.shape[1]
    onehot = jax.nn.one_hot(target, C, axis=1, dtype=jnp.float32)   # (N, C, D, H, W)
    total = 0.0
    for i in range(C):
        p = probs[:, i].reshape(N, -1).astype(jnp.float32)
        t = onehot[:, i].reshape(N, -1)
        inter = (p * t).sum(1)
        dice = (2.0 * inter + 1.0) / (p.sum(1) + t.sum(1) + 1.0)
        loss = 1.0 - dice.sum() / N
        # F.binary_cross_entropy clamps log at -100; kernel matches that.
        bce = -(t * jnp.maximum(jnp.log(p), -100.0)
                + (1.0 - t) * jnp.maximum(jnp.log(1.0 - p), -100.0)).mean()
        total = total + loss + bce
    return total / C


if __name__ == "__main__":
    key = jax.random.PRNGKey(0)
    k_probs, k_labels = jax.random.split(key)

    N, C, D, H, W = 2, 4, 4, 8, 8   # M = D*H*W = 256
    # probabilities in (0, 1), as F.binary_cross_entropy requires
    probs = jax.nn.sigmoid(
        jax.random.normal(k_probs, (N, C, D, H, W), dtype=jnp.float32))
    target = jax.random.randint(k_labels, (N, D, H, W), 0, C, dtype=jnp.int32)

    loss = jax.block_until_ready(multiclass_dice_loss(probs, target))
    ref = jax.block_until_ready(_reference(probs, target))
    assert jnp.allclose(loss, ref, rtol=1e-5, atol=1e-5), (loss, ref)

    print("KERNEL_OK")
</pallas_src>

<mosaic_0001>
module attributes {stable_mosaic.version = 11 : i64} {
  func.func @_dice_bce_kernel(%arg0: i32, %arg1: i32, %arg2: memref<2x4x8x128xf32, #tpu.memory_space<vmem>>, %arg3: memref<2x8x128xi32, #tpu.memory_space<vmem>>, %arg4: memref<1x4x2x4x128xf32, #tpu.memory_space<vmem>>) attributes {dimension_semantics = [#tpu.dimension_semantics<parallel>, #tpu.dimension_semantics<arbitrary>], iteration_bounds = array<i64: 1, 1>, scalar_prefetch = 0 : i64, scratch_operands = 0 : i64, tpu.core_type = #tpu.core_type<tc>, window_params = [{transform_indices = @transform_0, window_bounds = array<i64: 2, 4, 8, 128>}, {transform_indices = @transform_1, window_bounds = array<i64: 2, 8, 128>}, {transform_indices = @transform_2, window_bounds = array<i64: 1, 4, 2, 4, 128>}]} {
    %c0_i32 = arith.constant 0 : i32
    %0 = arith.cmpi eq, %arg1, %c0_i32 : i32
    %1 = arith.extui %0 : i1 to i32
    %c0_i32_0 = arith.constant 0 : i32
    %2 = arith.cmpi ne, %1, %c0_i32_0 : i32
    scf.if %2 {
      %cst_51 = arith.constant 0.000000e+00 : f32
      %50 = vector.broadcast %cst_51 : f32 to vector<4x2x4x128xf32>
      %c0_52 = arith.constant 0 : index
      %c0_53 = arith.constant 0 : index
      %c0_54 = arith.constant 0 : index
      %c0_55 = arith.constant 0 : index
      %c0_56 = arith.constant 0 : index
      %51 = vector.load %arg4[%c0_52, %c0_53, %c0_54, %c0_55, %c0_56] : memref<1x4x2x4x128xf32, #tpu.memory_space<vmem>>, vector<1x4x2x4x128xf32>
      %52 = vector.shape_cast %51 : vector<1x4x2x4x128xf32> to vector<4x2x4x128xf32>
      %53 = vector.shape_cast %50 : vector<4x2x4x128xf32> to vector<1x4x2x4x128xf32>
      tpu.vector_store %arg4[%c0_52, %c0_53, %c0_54, %c0_55, %c0_56], %53 {strides = array<i32>} : memref<1x4x2x4x128xf32, #tpu.memory_space<vmem>>, vector<1x4x2x4x128xf32>,
    } else {
    }
    %c0 = arith.constant 0 : index
    %c0_1 = arith.constant 0 : index
    %c0_2 = arith.constant 0 : index
    %c0_3 = arith.constant 0 : index
    %3 = vector.load %arg2[%c0, %c0_1, %c0_2, %c0_3] : memref<2x4x8x128xf32, #tpu.memory_space<vmem>>, vector<2x4x8x128xf32>
    %c0_4 = arith.constant 0 : index
    %c0_5 = arith.constant 0 : index
    %c0_6 = arith.constant 0 : index
    %4 = vector.load %arg3[%c0_4, %c0_5, %c0_6] : memref<2x8x128xi32, #tpu.memory_space<vmem>>, vector<2x8x128xi32>
    %5 = tpu.iota {dimensions = array<i32: 1>} : vector<1x4x1x1xi32>
    %6 = vector.shape_cast %4 : vector<2x8x128xi32> to vector<2x1x8x128xi32>
    %7 = vector.broadcast %6 : vector<2x1x8x128xi32> to vector<2x4x8x128xi32>
    %8 = vector.broadcast %5 : vector<1x4x1x1xi32> to vector<2x4x8x128xi32>
    %9 = arith.cmpi eq, %7, %8 : vector<2x4x8x128xi32>
    %10 = arith.extui %9 : vector<2x4x8x128xi1> to vector<2x4x8x128xi32>
    %11 = arith.sitofp %10 : vector<2x4x8x128xi32> to vector<2x4x8x128xf32>
    %cst = arith.constant 1.000000e+00 : f32
    %12 = vector.broadcast %cst : f32 to vector<2x4x8x128xf32>
    %13 = arith.subf %12, %3 : vector<2x4x8x128xf32>
    %14 = arith.select %9, %3, %13 : vector<2x4x8x128xi1>, vector<2x4x8x128xf32>
    %15 = math.log %14 : vector<2x4x8x128xf32>
    %cst_7 = arith.constant -1.000000e+02 : f32
    %16 = vector.broadcast %cst_7 : f32 to vector<2x4x8x128xf32>
    %17 = arith.maximumf %15, %16 : vector<2x4x8x128xf32>
    %cst_8 = arith.constant 0.000000e+00 : f32
    %18 = vector.broadcast %cst_8 : f32 to vector<2x4x8x128xf32>
    %19 = arith.subf %18, %17 : vector<2x4x8x128xf32>
    %cst_9 = arith.constant 0.000000e+00 : f32
    %20 = vector.broadcast %cst_9 : f32 to vector<2x4x8x128xf32>
    %21 = arith.select %9, %3, %20 : vector<2x4x8x128xi1>, vector<2x4x8x128xf32>
    %c0_10 = arith.constant 0 : index
    %c0_11 = arith.constant 0 : index
    %c0_12 = arith.constant 0 : index
    %c0_13 = arith.constant 0 : index
    %c0_14 = arith.constant 0 : index
    %22 = vector.load %arg4[%c0_10, %c0_11, %c0_12, %c0_13, %c0_14] : memref<1x4x2x4x128xf32, #tpu.memory_space<vmem>>, vector<1x1x2x4x128xf32>
    %23 = vector.shape_cast %22 : vector<1x1x2x4x128xf32> to vector<2x4x128xf32>
    %cst_15 = arith.constant dense<0.000000e+00> : vector<2x4x128xf32>
    %24 = vector.multi_reduction <add>, %21, %cst_15 [2] : vector<2x4x8x128xf32> to vector<2x4x128xf32>
    %25 = arith.addf %23, %24 : vector<2x4x128xf32>
    %c0_16 = arith.constant 0 : index
    %c0_17 = arith.constant 0 : index
    %c0_18 = arith.constant 0 : index
    %c0_19 = arith.constant 0 : index
    %c0_20 = arith.constant 0 : index
    %26 = vector.load %arg4[%c0_16, %c0_17, %c0_18, %c0_19, %c0_20] : memref<1x4x2x4x128xf32, #tpu.memory_space<vmem>>, vector<1x1x2x4x128xf32>
    %27 = vector.shape_cast %26 : vector<1x1x2x4x128xf32> to vector<2x4x128xf32>
    %28 = vector.shape_cast %25 : vector<2x4x128xf32> to vector<1x1x2x4x128xf32>
    tpu.vector_store %arg4[%c0_16, %c0_17, %c0_18, %c0_19, %c0_20], %28 {strides = array<i32>} : memref<1x4x2x4x128xf32, #tpu.memory_space<vmem>>, vector<1x1x2x4x128xf32>,
    %c0_21 = arith.constant 0 : index
    %c1 = arith.constant 1 : index
    %c0_22 = arith.constant 0 : index
    %c0_23 = arith.constant 0 : index
    %c0_24 = arith.constant 0 : index
    %29 = vector.load %arg4[%c0_21, %c1, %c0_22, %c0_23, %c0_24] : memref<1x4x2x4x128xf32, #tpu.memory_space<vmem>>, vector<1x1x2x4x128xf32>
    %30 = vector.shape_cast %29 : vector<1x1x2x4x128xf32> to vector<2x4x128xf32>
    %cst_25 = arith.constant dense<0.000000e+00> : vector<2x4x128xf32>
    %31 = vector.multi_reduction <add>, %3, %cst_25 [2] : vector<2x4x8x128xf32> to vector<2x4x128xf32>
    %32 = arith.addf %30, %31 : vector<2x4x128xf32>
    %c0_26 = arith.constant 0 : index
    %c1_27 = arith.constant 1 : index
    %c0_28 = arith.constant 0 : index
    %c0_29 = arith.constant 0 : index
    %c0_30 = arith.constant 0 : index
    %33 = vector.load %arg4[%c0_26, %c1_27, %c0_28, %c0_29, %c0_30] : memref<1x4x2x4x128xf32, #tpu.memory_space<vmem>>, vector<1x1x2x4x128xf32>
    %34 = vector.shape_cast %33 : vector<1x1x2x4x128xf32> to vector<2x4x128xf32>
    %35 = vector.shape_cast %32 : vector<2x4x128xf32> to vector<1x1x2x4x128xf32>
    tpu.vector_store %arg4[%c0_26, %c1_27, %c0_28, %c0_29, %c0_30], %35 {strides = array<i32>} : memref<1x4x2x4x128xf32, #tpu.memory_space<vmem>>, vector<1x1x2x4x128xf32>,
    %c0_31 = arith.constant 0 : index
    %c2 = arith.constant 2 : index
    %c0_32 = arith.constant 0 : index
    %c0_33 = arith.constant 0 : index
    %c0_34 = arith.constant 0 : index
    %36 = vector.load %arg4[%c0_31, %c2, %c0_32, %c0_33, %c0_34] : memref<1x4x2x4x128xf32, #tpu.memory_space<vmem>>, vector<1x1x2x4x128xf32>
    %37 = vector.shape_cast %36 : vector<1x1x2x4x128xf32> to vector<2x4x128xf32>
    %cst_35 = arith.constant dense<0.000000e+00> : vector<2x4x128xf32>
    %38 = vector.multi_reduction <add>, %11, %cst_35 [2] : vector<2x4x8x128xf32> to vector<2x4x128xf32>
    %39 = arith.addf %37, %38 : vector<2x4x128xf32>
    %c0_36 = arith.constant 0 : index
    %c2_37 = arith.constant 2 : index
    %c0_38 = arith.constant 0 : index
    %c0_39 = arith.constant 0 : index
    %c0_40 = arith.constant 0 : index
    %40 = vector.load %arg4[%c0_36, %c2_37, %c0_38, %c0_39, %c0_40] : memref<1x4x2x4x128xf32, #tpu.memory_space<vmem>>, vector<1x1x2x4x128xf32>
    %41 = vector.shape_cast %40 : vector<1x1x2x4x128xf32> to vector<2x4x128xf32>
    %42 = vector.shape_cast %39 : vector<2x4x128xf32> to vector<1x1x2x4x128xf32>
    tpu.vector_store %arg4[%c0_36, %c2_37, %c0_38, %c0_39, %c0_40], %42 {strides = array<i32>} : memref<1x4x2x4x128xf32, #tpu.memory_space<vmem>>, vector<1x1x2x4x128xf32>,
    %c0_41 = arith.constant 0 : index
    %c3 = arith.constant 3 : index
    %c0_42 = arith.constant 0 : index
    %c0_43 = arith.constant 0 : index
    %c0_44 = arith.constant 0 : index
    %43 = vector.load %arg4[%c0_41, %c3, %c0_42, %c0_43, %c0_44] : memref<1x4x2x4x128xf32, #tpu.memory_space<vmem>>, vector<1x1x2x4x128xf32>
    %44 = vector.shape_cast %43 : vector<1x1x2x4x128xf32> to vector<2x4x128xf32>
    %cst_45 = arith.constant dense<0.000000e+00> : vector<2x4x128xf32>
    %45 = vector.multi_reduction <add>, %19, %cst_45 [2] : vector<2x4x8x128xf32> to vector<2x4x128xf32>
    %46 = arith.addf %44, %45 : vector<2x4x128xf32>
    %c0_46 = arith.constant 0 : index
    %c3_47 = arith.constant 3 : index
    %c0_48 = arith.constant 0 : index
    %c0_49 = arith.constant 0 : index
    %c0_50 = arith.constant 0 : index
    %47 = vector.load %arg4[%c0_46, %c3_47, %c0_48, %c0_49, %c0_50] : memref<1x4x2x4x128xf32, #tpu.memory_space<vmem>>, vector<1x1x2x4x128xf32>
    %48 = vector.shape_cast %47 : vector<1x1x2x4x128xf32> to vector<2x4x128xf32>
    %49 = vector.shape_cast %46 : vector<2x4x128xf32> to vector<1x1x2x4x128xf32>
    tpu.vector_store %arg4[%c0_46, %c3_47, %c0_48, %c0_49, %c0_50], %49 {strides = array<i32>} : memref<1x4x2x4x128xf32, #tpu.memory_space<vmem>>, vector<1x1x2x4x128xf32>,
    return
  }
  func.func @transform_0(%arg0: i32, %arg1: i32) -> (i32, i32, i32, i32) {
    %c1_i32 = arith.constant 1 : i32
    %0 = arith.muli %arg0, %c1_i32 : i32
    %1 = arith.addi %0, %arg1 : i32
    %c0_i32 = arith.constant 0 : i32
    %c0_i32_0 = arith.constant 0 : i32
    %c0_i32_1 = arith.constant 0 : i32
    %c0_i32_2 = arith.constant 0 : i32
    return %c0_i32, %c0_i32_0, %1, %c0_i32_1 : i32, i32, i32, i32
  }
  func.func @transform_1(%arg0: i32, %arg1: i32) -> (i32, i32, i32) {
    %c1_i32 = arith.constant 1 : i32
    %0 = arith.muli %arg0, %c1_i32 : i32
    %1 = arith.addi %0, %arg1 : i32
    %c0_i32 = arith.constant 0 : i32
    %c0_i32_0 = arith.constant 0 : i32
    %c0_i32_1 = arith.constant 0 : i32
    return %c0_i32, %1, %c0_i32_0 : i32, i32, i32
  }
  func.func @transform_2(%arg0: i32, %arg1: i32) -> (i32, i32, i32, i32, i32) {
    %c0_i32 = arith.constant 0 : i32
    %c0_i32_0 = arith.constant 0 : i32
    %c0_i32_1 = arith.constant 0 : i32
    %c0_i32_2 = arith.constant 0 : i32
    %c0_i32_3 = arith.constant 0 : i32
    return %arg0, %c0_i32, %c0_i32_0, %c0_i32_1, %c0_i32_2 : i32, i32, i32, i32, i32
  }
}

</mosaic_0001>

<bundles_post_ra>
// kernel: multiclass_dice_loss.1
= control target key start
LH: loop header
LB: loop body
LE: loop exit
PB: predicated region body
PF: predicated region fallthrough
CT: control target
= control target key end

     0   :  { %v486_v0 = vmov 0.0   ;;  %vm205_vm4 = vcmask 1041409   ;;  %vm207_vm5 = vcmask 1042434   ;;  %vm209_vm6 = vcmask 1043459   ;;  %s760_s2 = inlined_call_operand.vmem [shape: f32[1,4,2,4,128], index: 2, kind: output, shape index: {}]   ;;  %s761_s0 = inlined_call_operand.vmem [shape: f32[2,4,8,128], index: 0, kind: input, shape index: {}]   ;;  %s762_s1 = inlined_call_operand.vmem [shape: s32[2,8,128], index: 1, kind: input, shape index: {}]  }
   0x1   :  { %49 = vst [vmem:[%s760_s2] sm:$0xf] %v486_v0  ;;  %v509_v1 = vld [vmem:[%s761_s0] sm:$0xff]  ;;  %v514_v2 = vld [vmem:[%s761_s0 + $0x8] sm:$0xff]  ;;  %v523_v3 = vld [vmem:[%s761_s0 + $0x10] sm:$0xff] }
   0x2   :  { %50 = vst [vmem:[%s760_s2 + $0x4] sm:$0xf] %v486_v0  ;;  %v528_v4 = vld [vmem:[%s761_s0 + $0x18] sm:$0xff]  ;;  %v533_v5 = vld [vmem:[%s762_s1] sm:$0xff]  ;;  %v223_v6 = vrot.slane %v509_v1, 4  ;;  %v229_v15 = vrot.slane %v514_v2, 4 }
   0x3   :  { %51 = vst [vmem:[%s760_s2 + $0x8] sm:$0xf] %v486_v0  ;;  %vm67_vm0 = vcmp.eq.s32.totalorder %v533_v5, 0  ;;  %vm68_vm1 = vcmp.eq.s32.totalorder %v533_v5, 1  ;;  %vm69_vm2 = vcmp.eq.s32.totalorder %v533_v5, 2  ;;  %vm70_vm3 = vcmp.eq.s32.totalorder %v533_v5, 3 }
   0x4   :  { %52 = vst [vmem:[%s760_s2 + $0xc] sm:$0xf] %v486_v0  ;;  %v139_v7 = vsel %vm67_vm0, %v509_v1, 0.0  ;;  %v140_v8 = vsel %vm68_vm1, %v514_v2, 0.0  ;;  %v141_v9 = vsel %vm69_vm2, %v523_v3, 0.0  ;;  %v142_v10 = vsel %vm70_vm3, %v528_v4, 0.0 }
   0x5   :  { %53 = vst [vmem:[%s760_s2 + $0x10] sm:$0xf] %v486_v0  ;;  %v149_v11 = vrot.slane %v139_v7, 4  ;;  %v155_v12 = vrot.slane %v140_v8, 4  ;;  %v161_v13 = vrot.slane %v141_v9, 4  ;;  %v167_v14 = vrot.slane %v142_v10, 4 }
   0x6   :  { %54 = vst [vmem:[%s760_s2 + $0x14] sm:$0xf] %v486_v0  ;;  %v576_v20 = vld [vmem:[%s762_s1 + $0x8] sm:$0xff]  ;;  %v224_v21 = vadd.f32 %v223_v6, %v509_v1  ;;  %v230_v22 = vadd.f32 %v229_v15, %v514_v2  ;;  %v589_v27 = vld [vmem:[%s761_s0 + $0x20] sm:$0xff]  ;;  %v607_v35 = vld [vmem:[%s761_s0 + $0x30] sm:$0xff]  ;;  %v235_v61 = vrot.slane %v523_v3, 4 }
   0x7   :  { %55 = vst [vmem:[%s760_s2 + $0x18] sm:$0xf] %v486_v0  ;;  %v150_v16 = vadd.f32 %v149_v11, %v139_v7  ;;  %v156_v17 = vadd.f32 %v155_v12, %v140_v8  ;;  %v162_v18 = vadd.f32 %v161_v13, %v141_v9  ;;  %v168_v19 = vadd.f32 %v167_v14, %v142_v10  ;;  %v594_v28 = vld [vmem:[%s761_s0 + $0x28] sm:$0xff]  ;;  %v612_v36 = vld [vmem:[%s761_s0 + $0x38] sm:$0xff] }
   0x8   :  { %56 = vst [vmem:[%s760_s2 + $0x1c] sm:$0xf] %v486_v0  ;;  %vm71_vm7 = vcmp.eq.s32.totalorder %v576_v20, 0  ;;  %vm72_vm8 = vcmp.eq.s32.totalorder %v576_v20, 1  ;;  %vm73_vm9 = vcmp.eq.s32.totalorder %v576_v20, 2  ;;  %vm74_vm10 = vcmp.eq.s32.totalorder %v576_v20, 3 }
   0x9   :  { %v151_v23 = vrot.slane %v150_v16, 2  ;;  %v157_v24 = vrot.slane %v156_v17, 2  ;;  %v163_v25 = vrot.slane %v162_v18, 2  ;;  %v169_v26 = vrot.slane %v168_v19, 2  ;;  %v147_v57 = vld [vmem:[%s760_s2] sm:$0xf] }
   0xa   :  { %v143_v29 = vsel %vm71_vm7, %v589_v27, 0.0  ;;  %v144_v30 = vsel %vm72_vm8, %v594_v28, 0.0  ;;  %v145_v37 = vsel %vm73_vm9, %v607_v35, 0.0  ;;  %v146_v38 = vsel %vm74_vm10, %v612_v36, 0.0 }
   0xb   :  { %v152_v31 = vadd.f32 %v151_v23, %v150_v16  ;;  %v158_v32 = vadd.f32 %v157_v24, %v156_v17  ;;  %v164_v33 = vadd.f32 %v163_v25, %v162_v18  ;;  %v170_v34 = vadd.f32 %v169_v26, %v168_v19 }
   0xc   :  { %v173_v39 = vrot.slane %v143_v29, 4  ;;  %v179_v40 = vrot.slane %v144_v30, 4  ;;  %v185_v47 = vrot.slane %v145_v37, 4  ;;  %v191_v48 = vrot.slane %v146_v38, 4 }
   0xd   :  { %v153_v41 = vrot.slane %v152_v31, 1  ;;  %v159_v42 = vrot.slane %v158_v32, 1  ;;  %v165_v43 = vrot.slane %v164_v33, 1  ;;  %v171_v44 = vrot.slane %v170_v34, 1 }
   0xe   :  { %v174_v45 = vadd.f32 %v173_v39, %v143_v29  ;;  %v180_v46 = vadd.f32 %v179_v40, %v144_v30  ;;  %v186_v55 = vadd.f32 %v185_v47, %v145_v37  ;;  %v192_v56 = vadd.f32 %v191_v48, %v146_v38  ;;  %v148_v37 = vld [vmem:[%s760_s2 + $0x4] sm:$0xf] }
   0xf   :  { %v154_v49 = vadd.f32 %v153_v41, %v152_v31  ;;  %v160_v50 = vadd.f32 %v159_v42, %v158_v32  ;;  %v166_v51 = vadd.f32 %v165_v43, %v164_v33  ;;  %v172_v52 = vadd.f32 %v171_v44, %v170_v34 }
  0x10   :  { %v175_v53 = vrot.slane %v174_v45, 2  ;;  %v181_v54 = vrot.slane %v180_v46, 2  ;;  %v225_v59 = vrot.slane %v224_v21, 2  ;;  %v231_v60 = vrot.slane %v230_v22, 2 }
  0x11   :  { %v206_v58 = vsel %vm205_vm4, %v160_v50, %v154_v49  ;;  %v187_v7 = vrot.slane %v186_v55, 2  ;;  %v193_v9 = vrot.slane %v192_v56, 2  ;;  %v236_v19 = vadd.f32 %v235_v61, %v523_v3 }
  0x12   :  { %v208_v62 = vsel %vm207_vm5, %v166_v51, %v206_v58  ;;  %v176_v63 = vadd.f32 %v175_v53, %v174_v45  ;;  %v182_v6 = vadd.f32 %v181_v54, %v180_v46  ;;  %v226_v10 = vadd.f32 %v225_v59, %v224_v21 }
  0x13   :  { %v210_v8 = vsel %vm209_vm6, %v172_v52, %v208_v62  ;;  %v232_v11 = vadd.f32 %v231_v60, %v230_v22  ;;  %v188_v15 = vadd.f32 %v187_v7, %v186_v55  ;;  %v194_v16 = vadd.f32 %v193_v9, %v192_v56 }
  0x14   :  { %v216_v12 = vadd.f32 %v210_v8, %v147_v57  ;;  %v177_v13 = vrot.slane %v176_v63, 1  ;;  %v183_v14 = vrot.slane %v182_v6, 1  ;;  %v227_v17 = vrot.slane %v226_v10, 1  ;;  %v457_v8 = vld [vmem:[%s760_s2 + $0x8] sm:$0xf] }
  0x15   :  { %v233_v18 = vrot.slane %v232_v11, 1  ;;  %v189_v25 = vrot.slane %v188_v15, 1  ;;  %v241_v26 = vrot.slane %v528_v4, 4  ;;  %v195_v21 = vrot.slane %v194_v16, 1 }
  0x16   :  { %218 = vst [vmem:[%s760_s2] sm:$0xf] %v216_v12  ;;  %v178_v23 = vadd.f32 %v177_v13, %v176_v63  ;;  %v184_v24 = vadd.f32 %v183_v14, %v182_v6  ;;  %v228_v22 = vadd.f32 %v227_v17, %v226_v10  ;;  %v237_v30 = vrot.slane %v236_v19, 2 }
  0x17   :  { %v234_v29 = vadd.f32 %v233_v18, %v232_v11  ;;  %v190_v31 = vadd.f32 %v189_v25, %v188_v15  ;;  %v242_v33 = vadd.f32 %v241_v26, %v528_v4  ;;  %v247_v34 = vrot.slane %v589_v27, 4 }
  0x18   :  { %v211_v32 = vsel %vm205_vm4, %v184_v24, %v178_v23  ;;  %v196_v38 = vadd.f32 %v195_v21, %v194_v16  ;;  %v238_v39 = vadd.f32 %v237_v30, %v236_v19  ;;  %v253_v41 = vrot.slane %v594_v28, 4 }
  0x19   :  { %v279_v40 = vsel %vm205_vm4, %v234_v29, %v228_v22  ;;  %v212_v42 = vsel %vm207_vm5, %v190_v31, %v211_v32  ;;  %v243_v43 = vrot.slane %v242_v33, 2  ;;  %v248_v44 = vadd.f32 %v247_v34, %v589_v27  ;;  %v458_v32 = vld [vmem:[%s760_s2 + $0xc] sm:$0xf] }
  0x1a   :  { %v259_v45 = vrot.slane %v607_v35, 4  ;;  %v213_v46 = vsel %vm209_vm6, %v196_v38, %v212_v42  ;;  %v239_v47 = vrot.slane %v238_v39, 1  ;;  %v254_v48 = vadd.f32 %v253_v41, %v594_v28 }
  0x1b   :  { %v265_v49 = vrot.slane %v612_v36, 4  ;;  %v217_v50 = vadd.f32 %v213_v46, %v148_v37  ;;  %v244_v51 = vadd.f32 %v243_v43, %v242_v33  ;;  %v249_v52 = vrot.slane %v248_v44, 2 }
  0x1c   :  { %v260_v53 = vadd.f32 %v259_v45, %v607_v35  ;;  %v240_v54 = vadd.f32 %v239_v47, %v238_v39  ;;  %v255_v55 = vrot.slane %v254_v48, 2  ;;  %v449_v57 = vsel %vm67_vm0, 1.0, %v486_v0 }
  0x1d   :  { %v266_v56 = vadd.f32 %v265_v49, %v612_v36  ;;  %219 = vst [vmem:[%s760_s2 + $0x4] sm:$0xf] %v217_v50  ;;  %v245_v58 = vrot.slane %v244_v51, 1  ;;  %v250_v59 = vadd.f32 %v249_v52, %v248_v44  ;;  %v450_v61 = vsel %vm68_vm1, 1.0, %v486_v0 }
  0x1e   :  { %v261_v60 = vrot.slane %v260_v53, 2  ;;  %v280_v62 = vsel %vm207_vm5, %v240_v54, %v279_v40  ;;  %v256_v63 = vadd.f32 %v255_v55, %v254_v48  ;;  %v451_v7 = vsel %vm69_vm2, 1.0, %v486_v0 }
  0x1f   :  { %v267_v6 = vrot.slane %v266_v56, 2  ;;  %v246_v9 = vadd.f32 %v245_v58, %v244_v51  ;;  %v251_v10 = vrot.slane %v250_v59, 1  ;;  %v452_v12 = vsel %vm70_vm3, 1.0, %v486_v0 }
  0x20   :  { %v262_v11 = vadd.f32 %v261_v60, %v260_v53  ;;  %v257_v13 = vrot.slane %v256_v63, 1  ;;  %v294_v15 = vrot.slane %v449_v57, 4  ;;  %v300_v16 = vrot.slane %v450_v61, 4 }
  0x21   :  { %v268_v14 = vadd.f32 %v267_v6, %v266_v56  ;;  %v281_v17 = vsel %vm209_vm6, %v246_v9, %v280_v62  ;;  %v252_v18 = vadd.f32 %v251_v10, %v250_v59  ;;  %v306_v23 = vrot.slane %v451_v7, 4 }
  0x22   :  { %v263_v19 = vrot.slane %v262_v11, 1  ;;  %v287_v24 = vadd.f32 %v457_v8, %v281_v17  ;;  %v258_v25 = vadd.f32 %v257_v13, %v256_v63  ;;  %v295_v21 = vadd.f32 %v449_v57, %v294_v15 }
  0x23   :  { %v269_v26 = vrot.slane %v268_v14, 1  ;;  %v301_v29 = vadd.f32 %v450_v61, %v300_v16  ;;  %v307_v30 = vadd.f32 %v451_v7, %v306_v23  ;;  %v312_v31 = vrot.slane %v452_v12, 4 }
  0x24   :  { %v264_v22 = vadd.f32 %v263_v19, %v262_v11  ;;  %459 = vst [vmem:[%s760_s2 + $0x8] sm:$0xf] %v287_v24  ;;  %v282_v34 = vsel %vm205_vm4, %v258_v25, %v252_v18  ;;  %v296_v37 = vrot.slane %v295_v21, 2  ;;  %v453_v38 = vsel %vm71_vm7, 1.0, %v486_v0 }
  0x25   :  { %v270_v33 = vadd.f32 %v269_v26, %v268_v14  ;;  %v302_v40 = vrot.slane %v301_v29, 2  ;;  %v308_v41 = vrot.slane %v307_v30, 2  ;;  %v313_v42 = vadd.f32 %v452_v12, %v312_v31  ;;  %v461_v12 = vld [vmem:[%s760_s2 + $0x10] sm:$0xf] }
  0x26   :  { %v283_v39 = vsel %vm207_vm5, %v264_v22, %v282_v34  ;;  %v297_v44 = vadd.f32 %v296_v37, %v295_v21  ;;  %v454_v45 = vsel %vm72_vm8, 1.0, %v486_v0  ;;  %v455_v46 = vsel %vm73_vm9, 1.0, %v486_v0 }
  0x27   :  { %v284_v43 = vsel %vm209_vm6, %v270_v33, %v283_v39  ;;  %v303_v48 = vadd.f32 %v302_v40, %v301_v29  ;;  %v309_v49 = vadd.f32 %v308_v41, %v307_v30  ;;  %v314_v50 = vrot.slane %v313_v42, 2 }
  0x28   :  { %v288_v47 = vadd.f32 %v458_v32, %v284_v43  ;;  %v298_v51 = vrot.slane %v297_v44, 1  ;;  %v456_v52 = vsel %vm74_vm10, 1.0, %v486_v0  ;;  %v318_v53 = vrot.slane %v453_v38, 4 }
  0x29   :  { %v324_v54 = vrot.slane %v454_v45, 4  ;;  %v304_v55 = vrot.slane %v303_v48, 1  ;;  %v310_v56 = vrot.slane %v309_v49, 1  ;;  %v315_v57 = vadd.f32 %v314_v50, %v313_v42 }
  0x2a   :  { %460 = vst [vmem:[%s760_s2 + $0xc] sm:$0xf] %v288_v47  ;;  %v330_v58 = vrot.slane %v455_v46, 4  ;;  %v299_v59 = vadd.f32 %v298_v51, %v297_v44  ;;  %v319_v60 = vadd.f32 %v453_v38, %v318_v53  ;;  %v336_v62 = vrot.slane %v456_v52, 4 }
  0x2b   :  { %v325_v61 = vadd.f32 %v454_v45, %v324_v54  ;;  %v305_v63 = vadd.f32 %v304_v55, %v303_v48  ;;  %v311_v6 = vadd.f32 %v310_v56, %v309_v49  ;;  %v316_v7 = vrot.slane %v315_v57, 1 }
  0x2c   :  { %v331_v8 = vadd.f32 %v455_v46, %v330_v58  ;;  %v320_v9 = vrot.slane %v319_v60, 2  ;;  %v337_v10 = vadd.f32 %v456_v52, %v336_v62  ;;  %v91_v11 = vsub.f32 1.0, %v509_v1 }
  0x2d   :  { %v326_v0 = vrot.slane %v325_v61, 2  ;;  %v317_v13 = vadd.f32 %v316_v7, %v315_v57  ;;  %v350_v14 = vsel %vm205_vm4, %v305_v63, %v299_v59  ;;  %v92_v16 = vsub.f32 1.0, %v514_v2 }
  0x2e   :  { %v332_v15 = vrot.slane %v331_v8, 2  ;;  %v351_v17 = vsel %vm207_vm5, %v311_v6, %v350_v14  ;;  %v321_v18 = vadd.f32 %v320_v9, %v319_v60  ;;  %v338_v23 = vrot.slane %v337_v10, 2 }
  0x2f   :  { %v327_v19 = vadd.f32 %v326_v0, %v325_v61  ;;  %v352_v24 = vsel %vm209_vm6, %v317_v13, %v351_v17  ;;  %v93_v26 = vsub.f32 1.0, %v523_v3  ;;  %v94_v21 = vsub.f32 1.0, %v528_v4 }
  0x30   :  { %v333_v25 = vadd.f32 %v332_v15, %v331_v8  ;;  %v358_v22 = vadd.f32 %v461_v12, %v352_v24  ;;  %v322_v29 = vrot.slane %v321_v18, 1  ;;  %v339_v31 = vadd.f32 %v338_v23, %v337_v10 }
  0x31   :  { %v328_v30 = vrot.slane %v327_v19, 1  ;;  %v99_v33 = vsel %vm67_vm0, %v509_v1, %v91_v11  ;;  %v100_v34 = vsel %vm68_vm1, %v514_v2, %v92_v16  ;;  %v101_v37 = vsel %vm69_vm2, %v523_v3, %v93_v26  ;;  %v462_v3 = vld [vmem:[%s760_s2 + $0x14] sm:$0xf] }
  0x32   :  { %v334_v32 = vrot.slane %v333_v25, 1  ;;  %463 = vst [vmem:[%s760_s2 + $0x10] sm:$0xf] %v358_v22  ;;  %v323_v38 = vadd.f32 %v322_v29, %v321_v18  ;;  %v340_v40 = vrot.slane %v339_v31, 1  ;;  %v102_v41 = vsel %vm70_vm3, %v528_v4, %v94_v21 }
  0x33   :  { %v329_v39 = vadd.f32 %v328_v30, %v327_v19  ;;  %470 = vlog2.f32 %v99_v33  ;;  %v95_v42 = vsub.f32 1.0, %v589_v27  ;;  %v96_v2 = vsub.f32 1.0, %v594_v28 }
  0x34   :  { %v335_v1 = vadd.f32 %v334_v32, %v333_v25  ;;  %v341_v43 = vadd.f32 %v340_v40, %v339_v31  ;;  %472 = vlog2.f32 %v100_v34  ;;  %v97_v45 = vsub.f32 1.0, %v607_v35 }
  0x35   :  { %v353_v44 = vsel %vm205_vm4, %v329_v39, %v323_v38  ;;  %474 = vlog2.f32 %v101_v37  ;;  %v98_v4 = vsub.f32 1.0, %v612_v36  ;;  %v103_v5 = vsel %vm71_vm7, %v589_v27, %v95_v42 }
  0x36   :  { %v354_v46 = vsel %vm207_vm5, %v335_v1, %v353_v44  ;;  %476 = vlog2.f32 %v102_v41  ;;  %v104_v48 = vsel %vm72_vm8, %v594_v28, %v96_v2  ;;  %v105_v49 = vsel %vm73_vm9, %v607_v35, %v97_v45 }
  0x37   :  { %v355_v47 = vsel %vm209_vm6, %v341_v43, %v354_v46  ;;  %v106_v51 = vsel %vm74_vm10, %v612_v36, %v98_v4  ;;  %478 = vlog2.f32 %v103_v5 }
  0x38   :  { %v359_v50 = vadd.f32 %v462_v3, %v355_v47  ;;  %480 = vlog2.f32 %v104_v48 }
  0x39   :  { %v471_v52 = vpop.eup %470  ;;  %482 = vlog2.f32 %v105_v49 }
  0x3a   :  { %464 = vst [vmem:[%s760_s2 + $0x14] sm:$0xf] %v359_v50  ;;  %v473_v27 = vpop.eup %472  ;;  %v108_v53 = vmul.f32 0.6931472, %v471_v52  ;;  %484 = vlog2.f32 %v106_v51 }
  0x3b   :  { %v475_v28 = vpop.eup %474  ;;  %v110_v54 = vmul.f32 0.6931472, %v473_v27 }
  0x3c   :  { %v477_v55 = vpop.eup %476  ;;  %v112_v35 = vmul.f32 0.6931472, %v475_v28  ;;  %v123_v56 = vmax.f32 %v108_v53, -100.0 }
  0x3d   :  { %v479_v57 = vpop.eup %478  ;;  %v114_v58 = vmul.f32 0.6931472, %v477_v55  ;;  %v124_v20 = vmax.f32 %v110_v54, -100.0 }
  0x3e   :  { %v481_v36 = vpop.eup %480  ;;  %v125_v59 = vmax.f32 %v112_v35, -100.0  ;;  %v131_v60 = vsub.f32 0.0, %v123_v56  ;;  %v116_v61 = vmul.f32 0.6931472, %v479_v57  ;;  %v465_v56 = vld [vmem:[%s760_s2 + $0x18] sm:$0xf] }
  0x3f   :  { %v483_v62 = vpop.eup %482  ;;  %v126_v63 = vmax.f32 %v114_v58, -100.0  ;;  %v132_v6 = vsub.f32 0.0, %v124_v20  ;;  %v118_v7 = vmul.f32 0.6931472, %v481_v36 }
  0x40   :  { %v485_v8 = vpop.eup %484  ;;  %v133_v9 = vsub.f32 0.0, %v125_v59  ;;  %v365_v0 = vrot.slane %v131_v60, 4  ;;  %v120_v10 = vmul.f32 0.6931472, %v483_v62  ;;  %v127_v11 = vmax.f32 %v116_v61, -100.0 }
  0x41   :  { %v134_v12 = vsub.f32 0.0, %v126_v63  ;;  %v371_v13 = vrot.slane %v132_v6, 4  ;;  %v122_v14 = vmul.f32 0.6931472, %v485_v8  ;;  %v128_v15 = vmax.f32 %v118_v7, -100.0 }
  0x42   :  { %v366_v16 = vadd.f32 %v365_v0, %v131_v60  ;;  %v377_v17 = vrot.slane %v133_v9, 4  ;;  %v129_v18 = vmax.f32 %v120_v10, -100.0  ;;  %v135_v19 = vsub.f32 0.0, %v127_v11 }
  0x43   :  { %v372_v23 = vadd.f32 %v371_v13, %v132_v6  ;;  %v383_v24 = vrot.slane %v134_v12, 4  ;;  %v130_v25 = vmax.f32 %v122_v14, -100.0  ;;  %v136_v26 = vsub.f32 0.0, %v128_v15 }
  0x44   :  { %v367_v21 = vrot.slane %v366_v16, 2  ;;  %v378_v22 = vadd.f32 %v377_v17, %v133_v9  ;;  %v137_v29 = vsub.f32 0.0, %v129_v18  ;;  %v389_v30 = vrot.slane %v135_v19, 4  ;;  %v466_v9 = vld [vmem:[%s760_s2 + $0x1c] sm:$0xf] }
  0x45   :  { %v373_v31 = vrot.slane %v372_v23, 2  ;;  %v384_v32 = vadd.f32 %v383_v24, %v134_v12  ;;  %v138_v33 = vsub.f32 0.0, %v130_v25  ;;  %v395_v34 = vrot.slane %v136_v26, 4 }
  0x46   :  { %v368_v37 = vadd.f32 %v367_v21, %v366_v16  ;;  %v379_v38 = vrot.slane %v378_v22, 2  ;;  %v390_v39 = vadd.f32 %v389_v30, %v135_v19  ;;  %v401_v40 = vrot.slane %v137_v29, 4 }
  0x47   :  { %v374_v41 = vadd.f32 %v373_v31, %v372_v23  ;;  %v385_v1 = vrot.slane %v384_v32, 2  ;;  %v396_v42 = vadd.f32 %v395_v34, %v136_v26  ;;  %v407_v2 = vrot.slane %v138_v33, 4 }
  0x48   :  { %v369_v3 = vrot.slane %v368_v37, 1  ;;  %v380_v43 = vadd.f32 %v379_v38, %v378_v22  ;;  %v391_v44 = vrot.slane %v390_v39, 2  ;;  %v402_v45 = vadd.f32 %v401_v40, %v137_v29 }
  0x49   :  { %v375_v46 = vrot.slane %v374_v41, 1  ;;  %v386_v4 = vadd.f32 %v385_v1, %v384_v32  ;;  %v397_v5 = vrot.slane %v396_v42, 2  ;;  %v408_v47 = vadd.f32 %v407_v2, %v138_v33 }
  0x4a   :  { %v370_v48 = vadd.f32 %v369_v3, %v368_v37  ;;  %v381_v49 = vrot.slane %v380_v43, 1  ;;  %v392_v50 = vadd.f32 %v391_v44, %v390_v39  ;;  %v403_v51 = vrot.slane %v402_v45, 2 }
  0x4b   :  { %v376_v52 = vadd.f32 %v375_v46, %v374_v41  ;;  %v387_v27 = vrot.slane %v386_v4, 1  ;;  %v398_v53 = vadd.f32 %v397_v5, %v396_v42  ;;  %v409_v28 = vrot.slane %v408_v47, 2 }
  0x4c   :  { %v382_v54 = vadd.f32 %v381_v49, %v380_v43  ;;  %v393_v55 = vrot.slane %v392_v50, 1  ;;  %v404_v35 = vadd.f32 %v403_v51, %v402_v45 }
  0x4d   :  { %v388_v57 = vadd.f32 %v387_v27, %v386_v4  ;;  %v421_v58 = vsel %vm205_vm4, %v376_v52, %v370_v48  ;;  %v399_v20 = vrot.slane %v398_v53, 1  ;;  %v410_v36 = vadd.f32 %v409_v28, %v408_v47 }
  0x4e   :  { %v422_v59 = vsel %vm207_vm5, %v382_v54, %v421_v58  ;;  %v394_v60 = vadd.f32 %v393_v55, %v392_v50  ;;  %v405_v61 = vrot.slane %v404_v35, 1 }
  0x4f   :  { %v423_v62 = vsel %vm209_vm6, %v388_v57, %v422_v59  ;;  %v400_v63 = vadd.f32 %v399_v20, %v398_v53  ;;  %v411_v6 = vrot.slane %v410_v36, 1 }
  0x50   :  { %v429_v7 = vadd.f32 %v465_v56, %v423_v62  ;;  %v406_v8 = vadd.f32 %v405_v61, %v404_v35 }
  0x51   :  { %v412_v0 = vadd.f32 %v411_v6, %v410_v36  ;;  %v424_v10 = vsel %vm205_vm4, %v400_v63, %v394_v60 }
  0x52   :  { %467 = vst [vmem:[%s760_s2 + $0x18] sm:$0xf] %v429_v7  ;;  %v425_v11 = vsel %vm207_vm5, %v406_v8, %v424_v10 }
  0x53   :  { %v426_v12 = vsel %vm209_vm6, %v412_v0, %v425_v11 }
  0x54   :  { %v430_v13 = vadd.f32 %v466_v9, %v426_v12 }
  0x56   :  { %468 = vst [vmem:[%s760_s2 + $0x1c] sm:$0xf] %v430_v13 }

</bundles_post_ra>
